<compile_context>
chip_gen: v7x
topology: tpu7x:2x2x1
jax: 0.10.0
libtpu: 0.0.40
codegen_flags: <defaults>
</compile_context>

<pallas_src>
import math
import functools

import jax
import jax.numpy as jnp
from jax.experimental import pallas as pl
from jax.experimental.pallas import tpu as pltpu


# ----------------------------------------------------------------------------
# Buffer construction (matches PositionalEncoding.__init__)
# ----------------------------------------------------------------------------
def make_pe(d_model: int, max_len: int = 1000, dtype=jnp.float32):
    pos = jnp.arange(max_len, dtype=jnp.float32)[:, None]               # (max_len, 1)
    factor = -math.log(10000.0) / d_model
    div_even = jnp.exp(jnp.arange(0, d_model, 2, dtype=jnp.float32) * factor)
    div_odd = jnp.exp((jnp.arange(1, d_model, 2, dtype=jnp.float32) - 1.0) * factor)
    pe = jnp.zeros((1, max_len, d_model), dtype=jnp.float32)
    pe = pe.at[0, :, 0::2].set(jnp.sin(pos * div_even))
    pe = pe.at[0, :, 1::2].set(jnp.cos(pos * div_odd))
    return pe.astype(dtype)


# ----------------------------------------------------------------------------
# Kernel: (TB, S*D) elementwise add of PE + optional inverted dropout
# ----------------------------------------------------------------------------
def _pe_add_dropout_kernel(seed_ref, data_ref, pe_ref, out_ref, *,
                           p, training, tb, row_len):
    # data block: (TB, S*D); pe block: (1, S*D) -> broadcast over rows.
    x = data_ref[...] + pe_ref[...]

    if training and p > 0.0:
        if p >= 1.0:
            x = jnp.zeros_like(x)
        else:
            # Stateless counter-based PRNG: murmur-style finalizer on the
            # global element index, keyed by the seed. Works on TPU and in
            # interpret mode (no TPU-only prng primitives).
            seed = seed_ref[0].astype(jnp.uint32)
            b0 = pl.program_id(0).astype(jnp.uint32)
            rows = jax.lax.broadcasted_iota(jnp.uint32, x.shape, 0)
            cols = jax.lax.broadcasted_iota(jnp.uint32, x.shape, 1)
            idx = (b0 * jnp.uint32(tb) + rows) * jnp.uint32(row_len) + cols
            h = idx * jnp.uint32(0x9E3779B1) + seed
            h = h ^ (h >> 16)
            h = h * jnp.uint32(0x85EBCA6B)
            h = h ^ (h >> 13)
            h = h * jnp.uint32(0xC2B2AE35)
            h = h ^ (h >> 16)
            # Integer-threshold compare: keep with prob (1 - p).
            threshold = jnp.uint32(min(int(round(p * (1 << 32))), (1 << 32) - 1))
            keep = h >= threshold
            x = jnp.where(keep, x * (1.0 / (1.0 - p)), jnp.zeros_like(x))

    out_ref[...] = x.astype(out_ref.dtype)


# ----------------------------------------------------------------------------
# Block-row sizing: a few MiB per block, respecting sublane packing rules.
# ----------------------------------------------------------------------------
def _pick_tb(batch, row_bytes, itemsize, target_bytes=2 << 20):
    tb = max(1, target_bytes // max(1, row_bytes))
    if tb >= batch:
        return batch                      # full batch dim: always legal
    mult = 8 * max(1, 4 // itemsize)      # f32 -> 8, bf16 -> 16, int8 -> 32
    tb = max(mult, (tb // mult) * mult)
    return min(tb, batch)


# ----------------------------------------------------------------------------
# Wrapper
# ----------------------------------------------------------------------------
def positional_encoding(data, pe, *, p: float = 0.1, training: bool = False, seed: int = 0):
    """data: (batch, ..., seq, d_model); pe: (1, max_len, d_model)."""
    orig_shape = data.shape
    S, D = orig_shape[-2], orig_shape[-1]
    B = 1
    for d in orig_shape[:-2]:
        B *= d
    SD = S * D

    # Lane-dense layout: last dim = S*D (pure reshape glue, no compute).
    x = data.reshape(B, SD)
    pe_flat = pe[0, :S, :].reshape(1, SD).astype(data.dtype)   # pe in data dtype
    seed_arr = jnp.array([seed], dtype=jnp.int32)

    itemsize = jnp.dtype(data.dtype).itemsize
    TB = _pick_tb(B, SD * itemsize, itemsize)
    grid = (pl.cdiv(B, TB),)

    kernel = functools.partial(_pe_add_dropout_kernel,
                               p=float(p), training=bool(training),
                               tb=TB, row_len=SD)

    out = pl.pallas_call(
        kernel,
        out_shape=jax.ShapeDtypeStruct((B, SD), data.dtype),
        grid_spec=pltpu.PrefetchScalarGridSpec(
            num_scalar_prefetch=1,
            grid=grid,
            in_specs=[
                pl.BlockSpec((TB, SD), lambda i, seed: (i, 0)),
                pl.BlockSpec((1, SD), lambda i, seed: (0, 0)),
            ],
            out_specs=pl.BlockSpec((TB, SD), lambda i, seed: (i, 0)),
        ),
        compiler_params=pltpu.CompilerParams(
            dimension_semantics=("parallel",),
        ),
    )(seed_arr, x, pe_flat)
    return out.reshape(orig_shape)


# ----------------------------------------------------------------------------
# Main
# ----------------------------------------------------------------------------
if __name__ == "__main__":
    key = jax.random.PRNGKey(0)
    batch, seq, d_model = 2, 8, 32
    max_len = 1000
    dropout_p = 0.1

    data = jax.random.normal(key, (batch, seq, d_model), dtype=jnp.float32)
    pe = make_pe(d_model, max_len=max_len)

    # Eval mode (dropout is identity): verify against plain-JAX reference.
    out_eval = positional_encoding(data, pe, p=dropout_p, training=False)
    out_eval = jax.block_until_ready(out_eval)
    ref = data + pe[:, :seq]
    assert out_eval.shape == data.shape
    assert jnp.allclose(out_eval, ref, atol=1e-5, rtol=1e-5), "eval-mode mismatch"

    # Training mode (dropout active). RNG stream cannot match PyTorch
    # bit-for-bit; check structure instead: every surviving element equals
    # (data + pe) * 1/(1-p), dropped elements are exactly zero.
    out_train = positional_encoding(data, pe, p=dropout_p, training=True, seed=123)
    out_train = jax.block_until_ready(out_train)
    assert out_train.shape == data.shape
    assert bool(jnp.all(jnp.isfinite(out_train)))
    scaled_ref = ref * (1.0 / (1.0 - dropout_p))
    kept = out_train != 0
    assert jnp.allclose(jnp.where(kept, out_train, 0.0),
                        jnp.where(kept, scaled_ref, 0.0),
                        atol=1e-5, rtol=1e-5), "training-mode kept values mismatch"

    print("KERNEL_OK")
</pallas_src>

<mosaic_0001>
module attributes {stable_mosaic.version = 11 : i64} {
  func.func @_pe_add_dropout_kernel(%arg0: i32, %arg1: memref<1xi32, #tpu.memory_space<smem>>, %arg2: memref<2x256xf32, #tpu.memory_space<vmem>>, %arg3: memref<1x256xf32, #tpu.memory_space<vmem>>, %arg4: memref<2x256xf32, #tpu.memory_space<vmem>>) attributes {dimension_semantics = [#tpu.dimension_semantics<parallel>], iteration_bounds = array<i64: 1>, scalar_prefetch = 1 : i64, scratch_operands = 0 : i64, tpu.core_type = #tpu.core_type<tc>, window_params = [{transform_indices = @transform_0, window_bounds = array<i64: 2, 256>}, {pipeline_mode = #tpu.pipeline_mode<synchronous>, transform_indices = @transform_1, window_bounds = array<i64: 1, 256>}, {transform_indices = @transform_2, window_bounds = array<i64: 2, 256>}]} {
    %c0 = arith.constant 0 : index
    %c0_0 = arith.constant 0 : index
    %0 = vector.load %arg2[%c0, %c0_0] : memref<2x256xf32, #tpu.memory_space<vmem>>, vector<2x256xf32>
    %c0_1 = arith.constant 0 : index
    %c0_2 = arith.constant 0 : index
    %1 = vector.load %arg3[%c0_1, %c0_2] : memref<1x256xf32, #tpu.memory_space<vmem>>, vector<1x256xf32>
    %2 = vector.broadcast %1 : vector<1x256xf32> to vector<2x256xf32>
    %3 = arith.addf %0, %2 : vector<2x256xf32>
    %c0_3 = arith.constant 0 : index
    %c0_4 = arith.constant 0 : index
    %4 = vector.load %arg4[%c0_3, %c0_4] : memref<2x256xf32, #tpu.memory_space<vmem>>, vector<2x256xf32>
    tpu.vector_store %arg4[%c0_3, %c0_4], %3 {strides = array<i32>} : memref<2x256xf32, #tpu.memory_space<vmem>>, vector<2x256xf32>,
    return
  }
  func.func @transform_0(%arg0: i32, %arg1: memref<1xi32, #tpu.memory_space<smem>>) -> (i32, i32) {
    %c0_i32 = arith.constant 0 : i32
    %c0_i32_0 = arith.constant 0 : i32
    return %arg0, %c0_i32 : i32, i32
  }
  func.func @transform_1(%arg0: i32, %arg1: memref<1xi32, #tpu.memory_space<smem>>) -> (i32, i32) {
    %c0_i32 = arith.constant 0 : i32
    %c0_i32_0 = arith.constant 0 : i32
    %c0_i32_1 = arith.constant 0 : i32
    return %c0_i32, %c0_i32_0 : i32, i32
  }
  func.func @transform_2(%arg0: i32, %arg1: memref<1xi32, #tpu.memory_space<smem>>) -> (i32, i32) {
    %c0_i32 = arith.constant 0 : i32
    %c0_i32_0 = arith.constant 0 : i32
    return %arg0, %c0_i32 : i32, i32
  }
}

</mosaic_0001>

<bundles_post_ra>
// kernel: tpu_custom_call.1
= control target key start
LH: loop header
LB: loop body
LE: loop exit
PB: predicated region body
PF: predicated region fallthrough
CT: control target
= control target key end

     0   :  { %9 = vsyncpa [#allocation5], 0  ;;  %s164_s0 = inlined_call_operand.<no memory space> [shape: s32[1], index: 0, kind: input, shape index: {}]   ;;  %s165_s1 = inlined_call_operand.hbm [shape: f32[2,256], index: 1, kind: input, shape index: {}]   ;;  %s166_s2 = inlined_call_operand.vmem [shape: f32[1,256], index: 2, kind: input, shape index: {}]   ;;  %s167_s3 = inlined_call_operand.hbm [shape: f32[2,256], index: 3, kind: output, shape index: {}]  }
   0x1   :  { %10 = vsyncpa [#allocation6], 0  ;;  %s114_s12 = smov [#allocation4]   ;;  %s66_s16 = scalar_lea.hbm %s165_s1, 64 }
   0x2   :  { %s17_s13 = sshll.u32 %s114_s12, 4  ;;  %p67_p0 = scmp.ne.s32.totalorder %s165_s1, %s66_s16  ;;  %s18_s13 = int_to_ptr.vmem [resolvable:$true] %s17_s13 }
   0x3   :  { %p70_p1 = scmp.lt.u32.totalorder %s66_s16, %s165_s1 }
   0x5   :  { %p72_p2 = pnand %p70_p1, %p67_p0 }
   0x7   :  { %75 = shalt.err (!%p72_p2)
}
   0x8   :  { %s76_s20 = scalar_lea.vmem %s18_s13, 64  ;;  %p81_p4 = scmp.lt.s32.totalorder %s18_s13, %s18_s13 }
   0x9   :  { %p77_p3 = scmp.ne.s32.totalorder %s18_s13, %s76_s20  ;;  %p82_p5 = scmp.lt.s32.totalorder %s76_s20, %s76_s20 }
   0xb   :  { %p83_p6 = por %p82_p5, %p81_p4 }
   0xd   :  { %p84_p7 = pnand %p83_p6, %p77_p3 }
   0xf   :  { %87 = shalt.err (!%p84_p7)
}
  0x10   :  { %20 = dma.hbm_to_vmem [thread:$0]  %s165_s1, 64, %s18_s13, [#allocation5]  }
  0x11   :  { %110 = dma.done.wait [#allocation5], 64  }
  0x12   :  { %111 = vsyncadd [#allocation5], 4294967232  ;;  %v29_v0 = vlaneseq  ;;  %v115_v1 = vmov 1983009808   ;;  %v27_v7 = vld [vmem:[%s166_s2] sm:$0x3] }
  0x13   :  { %v39_v2 = vunpack.c.l.s4 %v115_v1  ;;  %v26_v12 = vld [vmem:[#allocation4] sm:$0xf]  ;;  %s116_s25 = smov [#allocation7]  }
  0x14   :  { %v30_v3 = vshrl.u32 %v29_v0, 7  ;;  %s54_s1 = sshll.u32 %s116_s25, 4  ;;  %s55_s1 = int_to_ptr.vmem [resolvable:$true] %s54_s1 }
  0x15   :  { %v40_v6 = vunpack.c.0.s8 %v39_v2  ;;  %s88_s26 = scalar_lea.vmem %s55_s1, 64  ;;  %p93_p9 = scmp.lt.s32.totalorder %s55_s1, %s55_s1 }
  0x16   :  { %v31_v4 = vsub.s32 0, %v30_v3  ;;  %v35_v5 = vsub.s32 1, %v30_v3  ;;  %p89_p8 = scmp.ne.s32.totalorder %s55_s1, %s88_s26  ;;  %p94_p10 = scmp.lt.s32.totalorder %s88_s26, %s88_s26 }
  0x17   :  { %v43_v10 = vsub.s32 %v40_v6, %v30_v3 }
  0x18   :  { %v32_v8 = vrot.slane %v27_v7, %v31_v4  ;;  %v36_v9 = vrot.slane %v27_v7, %v35_v5  ;;  %p95_p11 = por %p94_p10, %p93_p9 }
  0x1a   :  { %v37_v11 = vcombine.low %v32_v8, %v36_v9  ;;  %p96_p12 = pnand %p95_p11, %p89_p8 }
  0x1c   :  { %v44_v13 = vrot.slane %v37_v11, %v43_v10 }
  0x1e   :  { %v46_v14 = vadd.f32 %v44_v13, %v26_v12 }
  0x20   :  { %47 = vst [vmem:[#allocation7] sm:$0xf] %v46_v14 }
  0x21   :  { %99 = shalt.err (!%p96_p12)
}
  0x22   :  { %s100_s28 = scalar_lea.hbm %s167_s3, 64 }
  0x23   :  { %p101_p13 = scmp.ne.s32.totalorder %s167_s3, %s100_s28  ;;  %p104_p0 = scmp.lt.u32.totalorder %s100_s28, %s167_s3 }
  0x25   :  { %p106_p1 = pnand %p104_p0, %p101_p13 }
  0x27   :  { %109 = shalt.err (!%p106_p1)
}
  0x28   :  { %57 = dma.vmem_to_hbm [thread:$0]  %s55_s1, 64, %s167_s3, [#allocation6]  }
  0x29   :  { %112 = dma.done.wait [#allocation6], 64  }
  0x2a   :  { %113 = vsyncadd [#allocation6], 4294967232 }
  0x2b   :  { %61 = vsyncpa [#allocation5], 1 }
  0x2c   :  { %62 = vsyncpa [#allocation6], 1 }

</bundles_post_ra>
